<compile_context>
chip_gen: v6e
topology: v6e:2x2x1
jax: 0.10.0
libtpu: 0.0.40
codegen_flags: <defaults>
</compile_context>

<pallas_src>
import functools
import math

import jax
import jax.numpy as jnp
from jax.experimental import pallas as pl
from jax.experimental.pallas import tpu as pltpu


def _xavier_uniform(key, shape, fan_in, fan_out, dtype=jnp.float32):
    # Matches torch.nn.init.xavier_uniform_ (gain=1.0). The limit is symmetric
    # in fan_in/fan_out, so the (out, in) storage orientation does not matter.
    limit = math.sqrt(6.0 / (fan_in + fan_out))
    return jax.random.uniform(key, shape, dtype, minval=-limit, maxval=limit)


def init_pinn_params(key, n_hidden, n_layers):
    """Parameter init mirroring PINN.__init__/_init_weights.

    Weights are stored in PyTorch (out, in) orientation so the kernel's
    batch-in-lanes layout computes h_new = W @ h + b directly; biases are zero.
    """
    keys = jax.random.split(key, n_layers + 2)
    w_in = _xavier_uniform(keys[0], (n_hidden, 2), 2, n_hidden)           # (H, 2)
    b_in = jnp.zeros((n_hidden, 1), jnp.float32)                           # (H, 1)
    w_hid = jnp.stack([
        _xavier_uniform(keys[1 + l], (n_hidden, n_hidden), n_hidden, n_hidden)
        for l in range(n_layers)
    ])                                                                     # (L, H, H)
    b_hid = jnp.zeros((n_layers, n_hidden, 1), jnp.float32)                # (L, H, 1)
    w_out = _xavier_uniform(keys[-1], (n_hidden, 1), n_hidden, 1)          # (H, 1)
    b_out = jnp.zeros((1, 1), jnp.float32)                                 # (1, 1)
    energy = jnp.asarray(1.0, jnp.float32)                                 # nn.Parameter(1.0)
    return dict(w_in=w_in, b_in=b_in, w_hid=w_hid, b_hid=b_hid,
                w_out=w_out, b_out=b_out, energy=energy)


def _pinn_kernel(n_layers, bf16_tanh, rho_ref, z_ref, w_in_ref, b_in_ref,
                 w_hid_ref, b_hid_ref, w_out_ref, b_out_ref, o_ref):
    def act(pre):
        # Optional bf16 EUP path (v6e/v7x only); matmul accumulation stays f32.
        if bf16_tanh:
            return jnp.tanh(pre.astype(jnp.bfloat16)).astype(jnp.float32)
        return jnp.tanh(pre)

    rho = rho_ref[...]                  # (1, TM), batch in lanes
    zee = z_ref[...]                    # (1, TM)
    w_in = w_in_ref[...]                # (H, 2)
    b_in = b_in_ref[...]                # (H, 1), loaded once per grid step

    # Input layer (K=2): keep it off the MXU. Two VPU broadcast multiply-adds
    # ((H,1)*(1,TM) outer-product style) instead of a nearly empty MXU tile.
    h = act(w_in[:, 0:1] * rho + w_in[:, 1:2] * zee + b_in)   # (H, TM)

    # Hidden layers: (H,H) @ (H,TM) on the MXU, f32 accumulation.
    # n_layers is a static Python int -> unrolled (fine for small L).
    for l in range(n_layers):
        h = act(jnp.dot(w_hid_ref[l], h, preferred_element_type=jnp.float32)
                + b_hid_ref[l])

    # Output layer (out=1): VPU multiply + cross-sublane (XLU) reduce; the bias
    # is a single scalar read from SMEM (no padded (8,128) VMEM block).
    psi = jnp.sum(h * w_out_ref[...], axis=0, keepdims=True) + b_out_ref[0]
    o_ref[...] = psi.astype(o_ref.dtype)


def _pick_tile_m(n, n_hidden, tile_m):
    """Lane-tile selection: vreg-resident activations, >=2 grid steps if possible."""
    if tile_m is None:
        # Keep H * TM * 4 bytes around ~128 KiB (half of the 64x4 KiB vreg
        # file) so the (H, TM) activation tile plus temporaries stay
        # register-resident across the layer loop (H=32 -> TM=1024).
        tile_m = ((128 * 1024) // (4 * n_hidden) // 128) * 128
        tile_m = max(128, min(1024, tile_m))
    tile_m = max(128, (tile_m // 128) * 128)
    n128 = ((n + 127) // 128) * 128
    tile_m = min(tile_m, n128)
    # Keep at least 2 grid steps whenever the batch allows it so the
    # "parallel" grid axis can be sharded across both TensorCores on v7x.
    if n128 >= 256:
        tile_m = min(tile_m, max(128, ((n128 // 2) // 128) * 128))
    return tile_m


def pinn_forward(params, rho, z, *, n_layers, tile_m=None, bf16_tanh=False):
    """Equivalent of PINN.forward(rho, z) -> psi of shape (N, 1)."""
    assert rho.shape == z.shape and rho.ndim == 2 and rho.shape[1] == 1
    n = rho.shape[0]
    n_hidden = params["w_in"].shape[0]

    tile_m = _pick_tile_m(n, n_hidden, tile_m)
    n_total = ((n + tile_m - 1) // tile_m) * tile_m
    grid = (n_total // tile_m,)

    # (1, N) rows: metadata-only reshapes of the contiguous (N, 1) inputs; only
    # the lane-axis zero-pad (if any) touches memory. No concat/transpose pass.
    rho_row = rho.astype(jnp.float32).reshape(1, n)
    z_row = z.astype(jnp.float32).reshape(1, n)
    if n_total != n:
        pad = ((0, 0), (0, n_total - n))
        rho_row = jnp.pad(rho_row, pad)
        z_row = jnp.pad(z_row, pad)

    kernel = functools.partial(_pinn_kernel, n_layers, bf16_tanh)
    const = lambda *shape: pl.BlockSpec(shape, lambda i: (0,) * len(shape))

    weight_bytes = 4 * sum(int(params[k].size) for k in
                           ("w_in", "b_in", "w_hid", "b_hid", "w_out", "b_out"))
    cost = pl.CostEstimate(
        flops=2 * n_total * n_hidden * (n_hidden * n_layers + 3),
        transcendentals=n_total * n_hidden * (n_layers + 1),
        bytes_accessed=4 * 3 * n_total + weight_bytes,
    )

    out = pl.pallas_call(
        kernel,
        out_shape=jax.ShapeDtypeStruct((1, n_total), jnp.float32),
        grid_spec=pltpu.PrefetchScalarGridSpec(
            num_scalar_prefetch=0,
            grid=grid,
            in_specs=[
                pl.BlockSpec((1, tile_m), lambda i: (0, i)),        # rho (batch in lanes)
                pl.BlockSpec((1, tile_m), lambda i: (0, i)),        # z   (batch in lanes)
                const(n_hidden, 2),                                 # w_in  (constant index_map:
                const(n_hidden, 1),                                 # b_in   DMA'd once, resident)
                const(n_layers, n_hidden, n_hidden),                # w_hid
                const(n_layers, n_hidden, 1),                       # b_hid
                const(n_hidden, 1),                                 # w_out
                pl.BlockSpec(memory_space=pltpu.MemorySpace.SMEM),  # b_out scalar in SMEM
            ],
            out_specs=pl.BlockSpec((1, tile_m), lambda i: (0, i)),  # lane-dense psi slab
        ),
        compiler_params=pltpu.CompilerParams(
            dimension_semantics=("parallel",)),
        cost_estimate=cost,
    )(rho_row, z_row, params["w_in"], params["b_in"], params["w_hid"],
      params["b_hid"], params["w_out"], params["b_out"].reshape(1))

    # (1, n_total) lane-dense slab -> (N, 1) column vector (matches PyTorch).
    return out.reshape(n_total, 1)[:n]


def pinn_forward_ref(params, rho, z, *, n_layers):
    """Pure-JAX reference matching the PyTorch forward."""
    x = jnp.concatenate((rho, z), axis=1).astype(jnp.float32)          # (N, 2)
    h = jnp.tanh(x @ params["w_in"].T + params["b_in"][:, 0])
    for l in range(n_layers):
        h = jnp.tanh(h @ params["w_hid"][l].T + params["b_hid"][l][:, 0])
    return h @ params["w_out"] + params["b_out"][0]


if __name__ == "__main__":
    n_hidden = 32
    n_layers = 2
    batch = 16

    key = jax.random.PRNGKey(0)
    k_param, k_rho, k_z = jax.random.split(key, 3)
    params = init_pinn_params(k_param, n_hidden, n_layers)

    rho = jax.random.normal(k_rho, (batch, 1), jnp.float32)
    z = jax.random.normal(k_z, (batch, 1), jnp.float32)

    psi = pinn_forward(params, rho, z, n_layers=n_layers)
    psi = jax.block_until_ready(psi)

    psi_ref = pinn_forward_ref(params, rho, z, n_layers=n_layers)
    assert psi.shape == (batch, 1)
    assert jnp.allclose(psi, psi_ref, atol=1e-5, rtol=1e-5), "mismatch vs reference"

    # Also exercise a multi-tile batch (grid > 1: pad/megacore/pipelined path).
    big = 2048
    rho_b = jax.random.normal(k_rho, (big, 1), jnp.float32)
    z_b = jax.random.normal(k_z, (big, 1), jnp.float32)
    psi_b = jax.block_until_ready(pinn_forward(params, rho_b, z_b,
                                               n_layers=n_layers))
    psi_b_ref = pinn_forward_ref(params, rho_b, z_b, n_layers=n_layers)
    assert psi_b.shape == (big, 1)
    assert jnp.allclose(psi_b, psi_b_ref, atol=1e-5, rtol=1e-5), "mismatch (big)"

    # get_energy() is just a parameter read; no kernel needed.
    _ = params["energy"]

    print("KERNEL_OK")
</pallas_src>

<mosaic_0001>
module attributes {stable_mosaic.version = 11 : i64} {
  func.func @_pinn_kernel(%arg0: i32, %arg1: memref<1x128xf32, #tpu.memory_space<vmem>>, %arg2: memref<1x128xf32, #tpu.memory_space<vmem>>, %arg3: memref<32x2xf32, #tpu.memory_space<vmem>>, %arg4: memref<32x1xf32, #tpu.memory_space<vmem>>, %arg5: memref<2x32x32xf32, #tpu.memory_space<vmem>>, %arg6: memref<2x32x1xf32, #tpu.memory_space<vmem>>, %arg7: memref<32x1xf32, #tpu.memory_space<vmem>>, %arg8: memref<1xf32, #tpu.memory_space<smem>>, %arg9: memref<1x128xf32, #tpu.memory_space<vmem>>) attributes {dimension_semantics = [#tpu.dimension_semantics<parallel>], iteration_bounds = array<i64: 1>, scalar_prefetch = 0 : i64, scratch_operands = 0 : i64, tpu.core_type = #tpu.core_type<tc>, window_params = [{transform_indices = @transform_0, window_bounds = array<i64: 1, 128>}, {transform_indices = @transform_1, window_bounds = array<i64: 1, 128>}, {pipeline_mode = #tpu.pipeline_mode<synchronous>, transform_indices = @transform_2, window_bounds = array<i64: 32, 2>}, {pipeline_mode = #tpu.pipeline_mode<synchronous>, transform_indices = @transform_3, window_bounds = array<i64: 32, 1>}, {pipeline_mode = #tpu.pipeline_mode<synchronous>, transform_indices = @transform_4, window_bounds = array<i64: 2, 32, 32>}, {pipeline_mode = #tpu.pipeline_mode<synchronous>, transform_indices = @transform_5, window_bounds = array<i64: 2, 32, 1>}, {pipeline_mode = #tpu.pipeline_mode<synchronous>, transform_indices = @transform_6, window_bounds = array<i64: 32, 1>}, {transform_indices = @transform_7, window_bounds = array<i64: 1>}, {transform_indices = @transform_8, window_bounds = array<i64: 1, 128>}]} {
    %c0 = arith.constant 0 : index
    %c0_0 = arith.constant 0 : index
    %0 = vector.load %arg1[%c0, %c0_0] : memref<1x128xf32, #tpu.memory_space<vmem>>, vector<1x128xf32>
    %c0_1 = arith.constant 0 : index
    %c0_2 = arith.constant 0 : index
    %1 = vector.load %arg2[%c0_1, %c0_2] : memref<1x128xf32, #tpu.memory_space<vmem>>, vector<1x128xf32>
    %c0_3 = arith.constant 0 : index
    %c0_4 = arith.constant 0 : index
    %2 = vector.load %arg3[%c0_3, %c0_4] : memref<32x2xf32, #tpu.memory_space<vmem>>, vector<32x2xf32>
    %c0_5 = arith.constant 0 : index
    %c0_6 = arith.constant 0 : index
    %3 = vector.load %arg4[%c0_5, %c0_6] : memref<32x1xf32, #tpu.memory_space<vmem>>, vector<32x1xf32>
    %4 = vector.extract_strided_slice %2 {offsets = [0, 0], sizes = [32, 1], strides = [1, 1]} : vector<32x2xf32> to vector<32x1xf32>
    %5 = vector.broadcast %4 : vector<32x1xf32> to vector<32x128xf32>
    %6 = vector.broadcast %0 : vector<1x128xf32> to vector<32x128xf32>
    %7 = arith.mulf %5, %6 : vector<32x128xf32>
    %8 = vector.extract_strided_slice %2 {offsets = [0, 1], sizes = [32, 1], strides = [1, 1]} : vector<32x2xf32> to vector<32x1xf32>
    %9 = vector.broadcast %8 : vector<32x1xf32> to vector<32x128xf32>
    %10 = vector.broadcast %1 : vector<1x128xf32> to vector<32x128xf32>
    %11 = arith.mulf %9, %10 : vector<32x128xf32>
    %12 = arith.addf %7, %11 : vector<32x128xf32>
    %13 = vector.broadcast %3 : vector<32x1xf32> to vector<32x128xf32>
    %14 = arith.addf %12, %13 : vector<32x128xf32>
    %15 = math.tanh %14 : vector<32x128xf32>
    %c0_7 = arith.constant 0 : index
    %c0_8 = arith.constant 0 : index
    %c0_9 = arith.constant 0 : index
    %16 = vector.load %arg5[%c0_7, %c0_8, %c0_9] : memref<2x32x32xf32, #tpu.memory_space<vmem>>, vector<1x32x32xf32>
    %17 = vector.shape_cast %16 : vector<1x32x32xf32> to vector<32x32xf32>
    %cst = arith.constant dense<0.000000e+00> : vector<32x128xf32>
    %18 = tpu.matmul %17, %15, %cst {dimension_numbers = #tpu.dot_dimension_numbers<[1], [0], [0], [1], [0, 0, 1, 1], [], []>} : vector<32x32xf32>, vector<32x128xf32>, vector<32x128xf32> -> vector<32x128xf32>
    %c0_10 = arith.constant 0 : index
    %c0_11 = arith.constant 0 : index
    %c0_12 = arith.constant 0 : index
    %19 = vector.load %arg6[%c0_10, %c0_11, %c0_12] : memref<2x32x1xf32, #tpu.memory_space<vmem>>, vector<1x32x1xf32>
    %20 = vector.shape_cast %19 : vector<1x32x1xf32> to vector<32x1xf32>
    %21 = vector.broadcast %20 : vector<32x1xf32> to vector<32x128xf32>
    %22 = arith.addf %18, %21 : vector<32x128xf32>
    %23 = math.tanh %22 : vector<32x128xf32>
    %c1 = arith.constant 1 : index
    %c0_13 = arith.constant 0 : index
    %c0_14 = arith.constant 0 : index
    %24 = vector.load %arg5[%c1, %c0_13, %c0_14] : memref<2x32x32xf32, #tpu.memory_space<vmem>>, vector<1x32x32xf32>
    %25 = vector.shape_cast %24 : vector<1x32x32xf32> to vector<32x32xf32>
    %cst_15 = arith.constant dense<0.000000e+00> : vector<32x128xf32>
    %26 = tpu.matmul %25, %23, %cst_15 {dimension_numbers = #tpu.dot_dimension_numbers<[1], [0], [0], [1], [0, 0, 1, 1], [], []>} : vector<32x32xf32>, vector<32x128xf32>, vector<32x128xf32> -> vector<32x128xf32>
    %c1_16 = arith.constant 1 : index
    %c0_17 = arith.constant 0 : index
    %c0_18 = arith.constant 0 : index
    %27 = vector.load %arg6[%c1_16, %c0_17, %c0_18] : memref<2x32x1xf32, #tpu.memory_space<vmem>>, vector<1x32x1xf32>
    %28 = vector.shape_cast %27 : vector<1x32x1xf32> to vector<32x1xf32>
    %29 = vector.broadcast %28 : vector<32x1xf32> to vector<32x128xf32>
    %30 = arith.addf %26, %29 : vector<32x128xf32>
    %31 = math.tanh %30 : vector<32x128xf32>
    %c0_19 = arith.constant 0 : index
    %c0_20 = arith.constant 0 : index
    %32 = vector.load %arg7[%c0_19, %c0_20] : memref<32x1xf32, #tpu.memory_space<vmem>>, vector<32x1xf32>
    %33 = vector.broadcast %32 : vector<32x1xf32> to vector<32x128xf32>
    %34 = arith.mulf %31, %33 : vector<32x128xf32>
    %cst_21 = arith.constant dense<0.000000e+00> : vector<128xf32>
    %35 = vector.multi_reduction <add>, %34, %cst_21 [0] : vector<32x128xf32> to vector<128xf32>
    %36 = vector.shape_cast %35 : vector<128xf32> to vector<1x128xf32>
    %c0_22 = arith.constant 0 : index
    %37 = memref.load %arg8[%c0_22] : memref<1xf32, #tpu.memory_space<smem>>
    %38 = vector.broadcast %37 : f32 to vector<1x128xf32>
    %39 = arith.addf %36, %38 : vector<1x128xf32>
    %c0_23 = arith.constant 0 : index
    %c0_24 = arith.constant 0 : index
    %40 = vector.load %arg9[%c0_23, %c0_24] : memref<1x128xf32, #tpu.memory_space<vmem>>, vector<1x128xf32>
    tpu.vector_store %arg9[%c0_23, %c0_24], %39 {strides = array<i32>} : memref<1x128xf32, #tpu.memory_space<vmem>>, vector<1x128xf32>,
    return
  }
  func.func @transform_0(%arg0: i32) -> (i32, i32) {
    %c0_i32 = arith.constant 0 : i32
    %c0_i32_0 = arith.constant 0 : i32
    return %c0_i32, %arg0 : i32, i32
  }
  func.func @transform_1(%arg0: i32) -> (i32, i32) {
    %c0_i32 = arith.constant 0 : i32
    %c0_i32_0 = arith.constant 0 : i32
    return %c0_i32, %arg0 : i32, i32
  }
  func.func @transform_2(%arg0: i32) -> (i32, i32) {
    %c0_i32 = arith.constant 0 : i32
    %c0_i32_0 = arith.constant 0 : i32
    %c0_i32_1 = arith.constant 0 : i32
    return %c0_i32, %c0_i32_0 : i32, i32
  }
  func.func @transform_3(%arg0: i32) -> (i32, i32) {
    %c0_i32 = arith.constant 0 : i32
    %c0_i32_0 = arith.constant 0 : i32
    %c0_i32_1 = arith.constant 0 : i32
    return %c0_i32, %c0_i32_0 : i32, i32
  }
  func.func @transform_4(%arg0: i32) -> (i32, i32, i32) {
    %c0_i32 = arith.constant 0 : i32
    %c0_i32_0 = arith.constant 0 : i32
    %c0_i32_1 = arith.constant 0 : i32
    %c0_i32_2 = arith.constant 0 : i32
    return %c0_i32, %c0_i32_0, %c0_i32_1 : i32, i32, i32
  }
  func.func @transform_5(%arg0: i32) -> (i32, i32, i32) {
    %c0_i32 = arith.constant 0 : i32
    %c0_i32_0 = arith.constant 0 : i32
    %c0_i32_1 = arith.constant 0 : i32
    %c0_i32_2 = arith.constant 0 : i32
    return %c0_i32, %c0_i32_0, %c0_i32_1 : i32, i32, i32
  }
  func.func @transform_6(%arg0: i32) -> (i32, i32) {
    %c0_i32 = arith.constant 0 : i32
    %c0_i32_0 = arith.constant 0 : i32
    %c0_i32_1 = arith.constant 0 : i32
    return %c0_i32, %c0_i32_0 : i32, i32
  }
  func.func @transform_7(%arg0: i32) -> i32 {
    %c0_i32 = arith.constant 0 : i32
    %c0_i32_0 = arith.constant 0 : i32
    return %c0_i32 : i32
  }
  func.func @transform_8(%arg0: i32) -> (i32, i32) {
    %c0_i32 = arith.constant 0 : i32
    %c0_i32_0 = arith.constant 0 : i32
    return %c0_i32, %arg0 : i32, i32
  }
}

</mosaic_0001>

<bundles_post_ra>
// kernel: tpu_custom_call.1
= control target key start
LH: loop header
LB: loop body
LE: loop exit
PB: predicated region body
PF: predicated region fallthrough
CT: control target
= control target key end

     0   :  { %v563_v2 = vmov 1   ;;  %v564_v3 = vmov 0   ;;  %s715_s0 = inlined_call_operand.vmem [shape: f32[1,128], index: 0, kind: input, shape index: {}]   ;;  %s716_s1 = inlined_call_operand.vmem [shape: f32[1,128], index: 1, kind: input, shape index: {}]   ;;  %s717_s2 = inlined_call_operand.vmem [shape: f32[32,2], index: 2, kind: input, shape index: {}]   ;;  %s718_s3 = inlined_call_operand.vmem [shape: f32[32,1], index: 3, kind: input, shape index: {}]   ;;  %s719_s4 = inlined_call_operand.vmem [shape: f32[2,32,32], index: 4, kind: input, shape index: {}]   ;;  %s720_s5 = inlined_call_operand.vmem [shape: f32[2,32,1], index: 5, kind: input, shape index: {}]   ;;  %s721_s6 = inlined_call_operand.vmem [shape: f32[32,1], index: 6, kind: input, shape index: {}]   ;;  %s722_s7 = inlined_call_operand.<no memory space> [shape: f32[1], index: 7, kind: input, shape index: {}]   ;;  %s723_s8 = inlined_call_operand.hbm [shape: f32[1,128], index: 8, kind: output, shape index: {}]  }
   0x1   :  { %v36_v0 = vld [vmem:[%s717_s2 + $0x18] sm:$0xff]  ;;  %v35_v1 = vld [vmem:[%s717_s2 + $0x10] sm:$0xff]  ;;  %510 = vset.pattern.permute.xlu0 %v563_v2  ;;  %511 = vset.pattern.permute.xlu1 %v564_v3  ;;  %v34_v4 = vld [vmem:[%s717_s2 + $0x8] sm:$0xff] }
   0x2   :  { %84 = vperm.xlu0 %510, %v36_v0   ;;  %53 = vperm.xlu1 %511, %v35_v1  }
   0x6   :  { %512 = vset.pattern.permute.xlu1 %v563_v2  ;;  %76 = vperm.xlu0 %510, %v34_v4  }
   0x7   :  { %80 = vperm.xlu1 %512, %v35_v1  }
   0x8   :  { %14 = vsyncpa [#allocation4], 0  ;;  %v33_v5 = vld [vmem:[%s717_s2] sm:$0xff]  ;;  %v40_v6 = vld [vmem:[%s718_s3 + $0x18] sm:$0xff]  ;;  %vm157_vm0 = vcmask 261120   ;;  %s565_s14 = smov [#allocation3]  }
   0x9   :  { %v38_v7 = vld [vmem:[%s718_s3 + $0x8] sm:$0xff]  ;;  %v136_v8 = vld [vmem:[%s720_s5 + $0x18] sm:$0xff]  ;;  %v39_v9 = vld [vmem:[%s718_s3 + $0x10] sm:$0xff]  ;;  %s437_s15 = sshll.u32 %s565_s14, 4  ;;  %s438_s15 = int_to_ptr.vmem [resolvable:$true] %s437_s15 }
   0xa   :  { %514 = vset.pattern.permute.xlu0 %v564_v3  ;;  %v134_v10 = vld [vmem:[%s720_s5 + $0x8] sm:$0xff]  ;;  %v37_v11 = vld [vmem:[%s718_s3] sm:$0xff]  ;;  %v135_v13 = vld [vmem:[%s720_s5 + $0x10] sm:$0xff]  ;;  %s541_s16 = scalar_lea.vmem %s438_s15, 16  ;;  %s545_s17 = scalar_lea.vmem %s438_s15, 32 }
   0xb   :  { %513 = vset.pattern.permute.xlu1 %v564_v3  ;;  %58 = vperm.xlu0 %514, %v36_v0   ;;  %v455_v12 = vld [vmem:[%s720_s5 + $0x20] sm:$0xff]  ;;  %v457_v14 = vld [vmem:[%s720_s5 + $0x30] sm:$0xff]  ;;  %v456_v17 = vld [vmem:[%s720_s5 + $0x28] sm:$0xff]  ;;  %p542_p0 = scmp.ne.s32.totalorder %s438_s15, %s541_s16  ;;  %p546_p1 = scmp.lt.s32.totalorder %s438_s15, %s438_s15 }
   0xc   :  { %48 = vperm.xlu1 %513, %v34_v4   ;;  %v133_v15 = vld [vmem:[%s720_s5] sm:$0xff]  ;;  %v392_v18 = vld [vmem:[%s721_s6 + $0x10] sm:$0xff]  ;;  %v458_v20 = vld [vmem:[%s720_s5 + $0x38] sm:$0xff]  ;;  %p547_p2 = scmp.lt.s32.totalorder %s545_s17, %s541_s16 }
   0xd   :  { %v390_v16 = vld [vmem:[%s721_s6] sm:$0xff]  ;;  %v391_v21 = vld [vmem:[%s721_s6 + $0x8] sm:$0xff]  ;;  %v393_v22 = vld [vmem:[%s721_s6 + $0x18] sm:$0xff] }
   0xe   :  { %v129_v19 = vld [vmem:[%s719_s4] sm:$0xff]  ;;  %v130_v57 = vld [vmem:[%s719_s4 + $0x8] sm:$0xff]  ;;  %v131_v58 = vld [vmem:[%s719_s4 + $0x10] sm:$0xff]  ;;  %p548_p3 = por %p547_p2, %p546_p1 }
   0xf   :  { %43 = vperm.xlu0 %514, %v33_v5   ;;  %487 = vmatprep.mubr.msk.f32.mxu0 %vm157_vm0, %v129_v19  ;;  %v446_v27 = vld [vmem:[%s716_s1] ss:$0 sm:$0xff]  ;;  %v132_v59 = vld [vmem:[%s719_s4 + $0x18] sm:$0xff] }
  0x10   :  { %118 = vperm.xlu1 %513, %v40_v6   ;;  %v445_v29 = vld [vmem:[%s715_s0] ss:$0 sm:$0xff]  ;;  %p549_p4 = pnand %p548_p3, %p542_p0 }
  0x11   :  { %v451_v60 = vld [vmem:[%s719_s4 + $0x20] sm:$0xff] }
  0x12   :  { %501 = vmatprep.mubr.msk.f32.mxu1 %vm157_vm0, %v451_v60 }
  0x13   :  { %108 = vperm.xlu0 %514, %v38_v7  }
  0x14   :  { %515 = vset.pattern.permute.xlu1 %v563_v2 }
  0x15   :  { %72 = vperm.xlu1 %515, %v33_v5  }
  0x17   :  { %154 = vperm.xlu0 %514, %v136_v8  }
  0x19   :  { %516 = vset.pattern.permute.xlu1 %v564_v3 }
  0x1a   :  { %113 = vperm.xlu1 %516, %v39_v9  }
  0x1b   :  { %144 = vperm.xlu0 %514, %v134_v10  }
  0x1e   :  { %103 = vperm.xlu1 %516, %v37_v11  }
  0x1f   :  { %271 = vperm.xlu0 %514, %v455_v12  }
  0x22   :  { %149 = vperm.xlu1 %516, %v135_v13   ;;  %v452_v13 = vld [vmem:[%s719_s4 + $0x28] sm:$0xff] }
  0x23   :  { %281 = vperm.xlu0 %514, %v457_v14   ;;  %v453_v14 = vld [vmem:[%s719_s4 + $0x30] sm:$0xff] }
  0x26   :  { %139 = vperm.xlu1 %516, %v133_v15   ;;  %v454_v15 = vld [vmem:[%s719_s4 + $0x38] sm:$0xff] }
  0x27   :  { %396 = vperm.xlu0 %514, %v390_v16  }
  0x2a   :  { %276 = vperm.xlu1 %516, %v456_v17  }
  0x2b   :  { %406 = vperm.xlu0 %514, %v392_v18  }
  0x2e   :  { %286 = vperm.xlu1 %516, %v458_v20  }
  0x32   :  { %401 = vperm.xlu1 %516, %v391_v21  }
  0x36   :  { %411 = vperm.xlu1 %516, %v393_v22  }
  0x7d   :  { %v54_v23 = vpop.permute.xlu1 %53  ;;  %v85_v24 = vpop.permute.xlu0 %84 }
  0x7e   :  { %v96_v28 = vmul.f32 %v446_v27, %v85_v24  ;;  %v69_v41 = vmul.f32 %v445_v29, %v54_v23 }
  0x81   :  { %v77_v25 = vpop.permute.xlu0 %76 }
  0x82   :  { %v81_v26 = vpop.permute.xlu1 %80  ;;  %v94_v38 = vmul.f32 %v446_v27, %v77_v25 }
  0x83   :  { %v95_v37 = vmul.f32 %v446_v27, %v81_v26 }
  0x85   :  { %v99_v46 = vadd.f32 %v95_v37, %v69_v41 }
  0x86   :  { %v59_v30 = vpop.permute.xlu0 %58 }
  0x87   :  { %v70_v31 = vmul.f32 %v445_v29, %v59_v30  ;;  %v49_v32 = vpop.permute.xlu1 %48 }
  0x88   :  { %v68_v39 = vmul.f32 %v445_v29, %v49_v32 }
  0x89   :  { %v100_v33 = vadd.f32 %v96_v28, %v70_v31 }
  0x8a   :  { %v44_v36 = vpop.permute.xlu0 %43  ;;  %v98_v44 = vadd.f32 %v94_v38, %v68_v39 }
  0x8b   :  { %v119_v34 = vpop.permute.xlu1 %118  ;;  %v67_v43 = vmul.f32 %v445_v29, %v44_v36 }
  0x8c   :  { %v124_v35 = vadd.f32 %v119_v34, %v100_v33 }
  0x8e   :  { %517 = vtanh.f32 %v124_v35  ;;  %v109_v42 = vpop.permute.xlu0 %108 }
  0x8f   :  { %v122_v48 = vadd.f32 %v109_v42, %v98_v44 }
  0x90   :  { %v73_v40 = vpop.permute.xlu1 %72 }
  0x91   :  { %v93_v45 = vmul.f32 %v446_v27, %v73_v40 }
  0x92   :  { %v155_v61 = vpop.permute.xlu0 %154 }
  0x93   :  { %v97_v50 = vadd.f32 %v93_v45, %v67_v43 }
  0x95   :  { %v114_v47 = vpop.permute.xlu1 %113 }
  0x96   :  { %v123_v49 = vadd.f32 %v114_v47, %v99_v46  ;;  %v145_v3 = vpop.permute.xlu0 %144 }
  0x98   :  { %519 = vtanh.f32 %v123_v49 }
  0x99   :  { %v104_v51 = vpop.permute.xlu1 %103  ;;  %521 = vtanh.f32 %v122_v48  ;;  %v428_v48 = vstv %s722_s7 }
  0x9a   :  { %v121_v52 = vadd.f32 %v104_v51, %v97_v50  ;;  %v272_v17 = vpop.permute.xlu0 %271 }
  0x9b   :  { %v518_v53 = vpop.eup %517 }
  0x9c   :  { %523 = vtanh.f32 %v121_v52  ;;  %479 = vmatprep.subr.mxu0 %v518_v53 }
  0x9d   :  { %480 = vmatpush3.msra.mxu0 %v518_v53  ;;  %v150_v63 = vpop.permute.xlu1 %149 }
  0x9e   :  { %v282_v25 = vpop.permute.xlu0 %281 }
  0xa1   :  { %v140_v7 = vpop.permute.xlu1 %139 }
  0xa2   :  { %v397_v28 = vpop.permute.xlu0 %396 }
  0xa5   :  { %v520_v54 = vpop.eup %519  ;;  %v277_v16 = vpop.permute.xlu1 %276 }
  0xa6   :  { %481 = vmatprep.subr.mxu0 %v520_v54  ;;  %v522_v55 = vpop.eup %521  ;;  %v407_v36 = vpop.permute.xlu0 %406 }
  0xa7   :  { %482 = vmatpush3.msra.mxu0 %v520_v54 }
  0xa8   :  { %483 = vmatprep.subr.mxu0 %v522_v55 }
  0xa9   :  { %v524_v56 = vpop.eup %523  ;;  %484 = vmatpush3.msra.mxu0 %v522_v55  ;;  %v287_v22 = vpop.permute.xlu1 %286 }
  0xaa   :  { %485 = vmatprep.subr.mxu0 %v524_v56 }
  0xab   :  { %486 = vmatpush3.msra.mxu0 %v524_v56 }
  0xac   :  { %488 = vmatmul.mubr.msk.f32.vlgmr.msra.gmra.mxu0 %vm157_vm0, %v130_v57 }
  0xad   :  { %490 = vmatprep.mubr.msk.f32.mxu0 %vm157_vm0, %v131_v58  ;;  %v402_v31 = vpop.permute.xlu1 %401 }
  0xb0   :  { %491 = vmatmul.mubr.msk.f32.gmra.mxu0 %vm157_vm0, %v132_v59 }
  0xb1   :  { %v412_v39 = vpop.permute.xlu1 %411 }
 0x16c   :  { %v489_v62 = vpop.f32.mrf.mxu0 }
 0x16d   :  { %v242_v5 = vadd.f32 %v489_v62, %v145_v3 }
 0x16e   :  { %v236_v0 = vpop.f32.mrf.mxu0 }
 0x16f   :  { %v237_v8 = vadd.f32 %v236_v0, %v140_v7 }
 0x170   :  { %v492_v1 = vpop.f32.mrf.mxu0 }
 0x171   :  { %v252_v2 = vadd.f32 %v492_v1, %v155_v61 }
 0x172   :  { %v246_v4 = vpop.f32.mrf.mxu0 }
 0x173   :  { %525 = vtanh.f32 %v252_v2  ;;  %v247_v6 = vadd.f32 %v246_v4, %v150_v63 }
 0x175   :  { %527 = vtanh.f32 %v247_v6 }
 0x176   :  { %529 = vtanh.f32 %v242_v5 }
 0x177   :  { %531 = vtanh.f32 %v237_v8 }
 0x180   :  { %v526_v9 = vpop.eup %525 }
 0x181   :  { %493 = vmatprep.subr.mxu1 %v526_v9 }
 0x182   :  { %v528_v10 = vpop.eup %527  ;;  %494 = vmatpush3.msra.mxu1 %v526_v9 }
 0x183   :  { %495 = vmatprep.subr.mxu1 %v528_v10  ;;  %v530_v11 = vpop.eup %529 }
 0x184   :  { %496 = vmatpush3.msra.mxu1 %v528_v10  ;;  %v532_v12 = vpop.eup %531 }
 0x185   :  { %497 = vmatprep.subr.mxu1 %v530_v11 }
 0x186   :  { %498 = vmatpush3.msra.mxu1 %v530_v11 }
 0x187   :  { %499 = vmatprep.subr.mxu1 %v532_v12 }
 0x188   :  { %500 = vmatpush3.msra.mxu1 %v532_v12 }
 0x189   :  { %502 = vmatmul.mubr.msk.f32.vlgmr.msra.gmra.mxu1 %vm157_vm0, %v452_v13 }
 0x18a   :  { %504 = vmatprep.mubr.msk.f32.mxu1 %vm157_vm0, %v453_v14 }
 0x18d   :  { %505 = vmatmul.mubr.msk.f32.gmra.mxu1 %vm157_vm0, %v454_v15 }
 0x249   :  { %v503_v18 = vpop.f32.mrf.mxu1 }
 0x24a   :  { %v373_v19 = vadd.f32 %v503_v18, %v277_v16 }
 0x24b   :  { %v367_v20 = vpop.f32.mrf.mxu1 }
 0x24c   :  { %v368_v21 = vadd.f32 %v367_v20, %v272_v17  ;;  %533 = vtanh.f32 %v373_v19 }
 0x24d   :  { %v506_v23 = vpop.f32.mrf.mxu1 }
 0x24e   :  { %535 = vtanh.f32 %v368_v21  ;;  %v383_v24 = vadd.f32 %v506_v23, %v287_v22 }
 0x24f   :  { %v377_v26 = vpop.f32.mrf.mxu1 }
 0x250   :  { %v378_v27 = vadd.f32 %v377_v26, %v282_v25  ;;  %537 = vtanh.f32 %v383_v24 }
 0x252   :  { %539 = vtanh.f32 %v378_v27 }
 0x259   :  { %v534_v29 = vpop.eup %533 }
 0x25a   :  { %v415_v34 = vmul.f32 %v534_v29, %v402_v31 }
 0x25b   :  { %v536_v30 = vpop.eup %535 }
 0x25c   :  { %v414_v32 = vmul.f32 %v536_v30, %v397_v28 }
 0x25d   :  { %v538_v33 = vpop.eup %537 }
 0x25e   :  { %v418_v38 = vadd.f32 %v415_v34, %v414_v32  ;;  %v417_v40 = vmul.f32 %v538_v33, %v412_v39 }
 0x25f   :  { %v540_v35 = vpop.eup %539 }
 0x260   :  { %v416_v37 = vmul.f32 %v540_v35, %v407_v36 }
 0x262   :  { %v419_v41 = vadd.f32 %v418_v38, %v416_v37 }
 0x264   :  { %v420_v42 = vadd.f32 %v419_v41, %v417_v40 }
 0x266   :  { %v421_v43 = vrot.slane %v420_v42, 4 }
 0x268   :  { %v422_v44 = vadd.f32 %v421_v43, %v420_v42 }
 0x26a   :  { %v423_v45 = vrot.slane %v422_v44, 2 }
 0x26c   :  { %v424_v46 = vadd.f32 %v423_v45, %v422_v44 }
 0x26e   :  { %v425_v47 = vrot.slane %v424_v46, 1 }
 0x270   :  { %v426_v49 = vadd.f32 %v425_v47, %v424_v46 }
 0x272   :  { %v429_v50 = vadd.f32 %v428_v48, %v426_v49 }
 0x274   :  { %430 = vst [vmem:[#allocation3] sm:$0x1] %v429_v50 }
 0x275   :  { %552 = shalt.err (!%p549_p4)
}
 0x276   :  { %440 = dma.vmem_to_hbm [thread:$0]  %s438_s15, 16, %s723_s8, [#allocation4]  }
 0x277   :  { %561 = dma.done.wait [#allocation4], 16  }
 0x278   :  { %562 = vsyncadd [#allocation4], 4294967280 }
 0x279   :  { %444 = vsyncpa [#allocation4], 1 }

</bundles_post_ra>
